<compile_context>
chip_gen: v6e
topology: v6e:2x2x1
jax: 0.10.0
libtpu: 0.0.40
codegen_flags: <defaults>
</compile_context>

<pallas_src>
import functools

import jax
import jax.numpy as jnp
from jax.experimental import pallas as pl
from jax.experimental.pallas import tpu as pltpu


def _round_up(v, m):
    return ((v + m - 1) // m) * m


def _projector_kernel(x_ref,
                      w1_ref, b1_ref,
                      w2_ref, b2_ref,
                      w3_ref, b3_ref,
                      w4_ref, b4_ref,
                      w5_ref, b5_ref,
                      o_ref):
    # Operands may be f32 or bf16; accumulation is always f32 on the MXU.
    cdt = x_ref.dtype

    h = jnp.dot(x_ref[...], w1_ref[...], preferred_element_type=jnp.float32)
    h = jnp.maximum(h + b1_ref[...], 0.0).astype(cdt)

    h = jnp.dot(h, w2_ref[...], preferred_element_type=jnp.float32)
    h = jnp.maximum(h + b2_ref[...], 0.0).astype(cdt)

    h = jnp.dot(h, w3_ref[...], preferred_element_type=jnp.float32)
    h = jnp.maximum(h + b3_ref[...], 0.0).astype(cdt)

    h = jnp.dot(h, w4_ref[...], preferred_element_type=jnp.float32)
    h = jnp.maximum(h + b4_ref[...], 0.0).astype(cdt)

    h = jnp.dot(h, w5_ref[...], preferred_element_type=jnp.float32)
    o_ref[...] = (h + b5_ref[...]).astype(o_ref.dtype)


@functools.partial(jax.jit, static_argnames=("block_b", "use_bf16"))
def projector_forward(x, params, *, block_b=None, use_bf16=False):
    """x: [B, n_feature].  params: list of (W[in,out], b[1,out]) for 5 layers.

    block_b=None auto-picks a large batch tile (<=1024 rows) that keeps
    >=4 parallel grid steps for big batches.  use_bf16 casts x and weights to
    bf16 (f32 accumulation, f32 bias add / ReLU)."""
    out_dtype = x.dtype
    B, n_feature = x.shape
    n_output = params[-1][0].shape[1]

    compute_dtype = jnp.bfloat16 if use_bf16 else x.dtype
    align = 16 if use_bf16 else 8  # sublane packing: bf16 rows travel in pairs

    if block_b is None:
        block_b = min(1024, _round_up(max(1, pl.cdiv(B, 4)), align))
    block_b = _round_up(block_b, align)

    grid = pl.cdiv(B, block_b)
    b_pad = grid * block_b

    # Lane-dense output: pad final out dim to a multiple of 128 lanes.
    n_out_pad = 128 * pl.cdiv(n_output, 128)

    x_c = x.astype(compute_dtype)
    if b_pad != B:
        x_c = jnp.pad(x_c, ((0, b_pad - B), (0, 0)))

    flat_params = []
    in_specs = [pl.BlockSpec((block_b, n_feature), lambda i: (i, 0))]
    dims = [n_feature]
    n_layers = len(params)
    for li, (W, b) in enumerate(params):
        if li == n_layers - 1 and n_out_pad != n_output:
            W = jnp.pad(W, ((0, 0), (0, n_out_pad - n_output)))
            b = jnp.pad(b, ((0, 0), (0, n_out_pad - n_output)))
        W = W.astype(compute_dtype)
        b = b.astype(jnp.float32)  # bias add + ReLU stay f32
        flat_params.extend([W, b])
        # Weights/biases: whole array, constant index_map -> resident in VMEM
        # across all grid steps (do NOT tile K; hidden dims are tiny).
        in_specs.append(pl.BlockSpec(W.shape, lambda i: (0, 0)))
        in_specs.append(pl.BlockSpec(b.shape, lambda i: (0, 0)))
        dims.append(W.shape[1])

    out_spec = pl.BlockSpec((block_b, n_out_pad), lambda i: (i, 0))

    flops = 2 * b_pad * sum(dims[i] * dims[i + 1] for i in range(len(dims) - 1))
    param_bytes = sum(int(a.size) * a.dtype.itemsize for a in flat_params)
    bytes_accessed = (b_pad * n_feature * jnp.dtype(compute_dtype).itemsize
                      + b_pad * n_out_pad * jnp.dtype(out_dtype).itemsize
                      + param_bytes)

    out = pl.pallas_call(
        _projector_kernel,
        out_shape=jax.ShapeDtypeStruct((b_pad, n_out_pad), out_dtype),
        grid_spec=pltpu.PrefetchScalarGridSpec(
            num_scalar_prefetch=0,
            grid=(grid,),
            in_specs=in_specs,
            out_specs=out_spec,
        ),
        compiler_params=pltpu.CompilerParams(
            dimension_semantics=("parallel",),
        ),
        cost_estimate=pl.CostEstimate(
            flops=flops, transcendentals=0, bytes_accessed=bytes_accessed),
    )(x_c, *flat_params)

    return out[:B, :n_output]


def init_projector_params(key, n_feature, n_hidden, n_hidden2, n_hidden3,
                          n_hidden4, n_output, dtype=jnp.float32):
    """Mirror torch.nn.Linear default init (uniform +/- 1/sqrt(fan_in)).
    Weights stored as [in_dim, out_dim] (transposed vs PyTorch)."""
    dims = [n_feature, n_hidden, n_hidden2, n_hidden3, n_hidden4, n_output]
    params = []
    for i in range(5):
        fan_in, fan_out = dims[i], dims[i + 1]
        key, kw, kb = jax.random.split(key, 3)
        bound = 1.0 / jnp.sqrt(fan_in)
        W = jax.random.uniform(kw, (fan_in, fan_out), dtype, -bound, bound)
        b = jax.random.uniform(kb, (1, fan_out), dtype, -bound, bound)
        params.append((W, b))
    return params


def projector_reference(x, params):
    h = x
    for (W, b) in params[:-1]:
        h = jnp.maximum(h @ W + b, 0.0)
    W, b = params[-1]
    return h @ W + b


if __name__ == "__main__":
    key = jax.random.PRNGKey(0)

    # Small shapes consistent with Projector(n_feature, ..., n_output).
    n_feature, n_hidden, n_hidden2, n_hidden3, n_hidden4, n_output = 32, 64, 64, 32, 32, 16

    key, kx = jax.random.split(key)
    params = init_projector_params(key, n_feature, n_hidden, n_hidden2,
                                   n_hidden3, n_hidden4, n_output)

    # 1) Small batch, f32: strict check vs JAX reference.
    B = 8
    x_small = jax.random.normal(kx, (B, n_feature), jnp.float32)
    out = jax.block_until_ready(projector_forward(x_small, params))
    ref = projector_reference(x_small, params)
    assert out.shape == (B, n_output), out.shape
    assert jnp.allclose(out, ref, atol=1e-4, rtol=1e-4), "f32 mismatch vs reference"

    # 2) Ragged batch (B=100): exercises cdiv grid, multi-step pipeline and
    #    padded-tail slicing with the auto-selected block_b.
    key, kx2 = jax.random.split(key)
    x_ragged = jax.random.normal(kx2, (100, n_feature), jnp.float32)
    out2 = jax.block_until_ready(projector_forward(x_ragged, params))
    ref2 = projector_reference(x_ragged, params)
    assert out2.shape == (100, n_output), out2.shape
    assert jnp.allclose(out2, ref2, atol=1e-4, rtol=1e-4), "ragged f32 mismatch"

    # 3) bf16 operands with f32 accumulation (loose tolerance).
    out3 = jax.block_until_ready(projector_forward(x_ragged, params, use_bf16=True))
    assert out3.shape == (100, n_output), out3.shape
    assert jnp.allclose(out3.astype(jnp.float32), ref2, atol=0.15, rtol=0.15), \
        "bf16 mismatch vs reference"

    print("KERNEL_OK")
</pallas_src>

<mosaic_0001>
module attributes {stable_mosaic.version = 11 : i64} {
  func.func @_projector_kernel(%arg0: i32, %arg1: memref<8x32xf32, #tpu.memory_space<vmem>>, %arg2: memref<32x64xf32, #tpu.memory_space<vmem>>, %arg3: memref<1x64xf32, #tpu.memory_space<vmem>>, %arg4: memref<64x64xf32, #tpu.memory_space<vmem>>, %arg5: memref<1x64xf32, #tpu.memory_space<vmem>>, %arg6: memref<64x32xf32, #tpu.memory_space<vmem>>, %arg7: memref<1x32xf32, #tpu.memory_space<vmem>>, %arg8: memref<32x32xf32, #tpu.memory_space<vmem>>, %arg9: memref<1x32xf32, #tpu.memory_space<vmem>>, %arg10: memref<32x128xf32, #tpu.memory_space<vmem>>, %arg11: memref<1x128xf32, #tpu.memory_space<vmem>>, %arg12: memref<8x128xf32, #tpu.memory_space<vmem>>) attributes {dimension_semantics = [#tpu.dimension_semantics<parallel>], iteration_bounds = array<i64: 1>, scalar_prefetch = 0 : i64, scratch_operands = 0 : i64, tpu.core_type = #tpu.core_type<tc>, window_params = [{transform_indices = @transform_0, window_bounds = array<i64: 8, 32>}, {pipeline_mode = #tpu.pipeline_mode<synchronous>, transform_indices = @transform_1, window_bounds = array<i64: 32, 64>}, {pipeline_mode = #tpu.pipeline_mode<synchronous>, transform_indices = @transform_2, window_bounds = array<i64: 1, 64>}, {pipeline_mode = #tpu.pipeline_mode<synchronous>, transform_indices = @transform_3, window_bounds = array<i64: 64, 64>}, {pipeline_mode = #tpu.pipeline_mode<synchronous>, transform_indices = @transform_4, window_bounds = array<i64: 1, 64>}, {pipeline_mode = #tpu.pipeline_mode<synchronous>, transform_indices = @transform_5, window_bounds = array<i64: 64, 32>}, {pipeline_mode = #tpu.pipeline_mode<synchronous>, transform_indices = @transform_6, window_bounds = array<i64: 1, 32>}, {pipeline_mode = #tpu.pipeline_mode<synchronous>, transform_indices = @transform_7, window_bounds = array<i64: 32, 32>}, {pipeline_mode = #tpu.pipeline_mode<synchronous>, transform_indices = @transform_8, window_bounds = array<i64: 1, 32>}, {pipeline_mode = #tpu.pipeline_mode<synchronous>, transform_indices = @transform_9, window_bounds = array<i64: 32, 128>}, {pipeline_mode = #tpu.pipeline_mode<synchronous>, transform_indices = @transform_10, window_bounds = array<i64: 1, 128>}, {transform_indices = @transform_11, window_bounds = array<i64: 8, 128>}]} {
    %c0 = arith.constant 0 : index
    %c0_0 = arith.constant 0 : index
    %0 = vector.load %arg1[%c0, %c0_0] : memref<8x32xf32, #tpu.memory_space<vmem>>, vector<8x32xf32>
    %c0_1 = arith.constant 0 : index
    %c0_2 = arith.constant 0 : index
    %1 = vector.load %arg2[%c0_1, %c0_2] : memref<32x64xf32, #tpu.memory_space<vmem>>, vector<32x64xf32>
    %cst = arith.constant dense<0.000000e+00> : vector<8x64xf32>
    %2 = tpu.matmul %0, %1, %cst {dimension_numbers = #tpu.dot_dimension_numbers<[1], [0], [0], [1], [0, 0, 1, 1], [], []>} : vector<8x32xf32>, vector<32x64xf32>, vector<8x64xf32> -> vector<8x64xf32>
    %c0_3 = arith.constant 0 : index
    %c0_4 = arith.constant 0 : index
    %3 = vector.load %arg3[%c0_3, %c0_4] : memref<1x64xf32, #tpu.memory_space<vmem>>, vector<1x64xf32>
    %4 = vector.broadcast %3 : vector<1x64xf32> to vector<8x64xf32>
    %5 = arith.addf %2, %4 : vector<8x64xf32>
    %cst_5 = arith.constant 0.000000e+00 : f32
    %6 = vector.broadcast %cst_5 : f32 to vector<8x64xf32>
    %7 = arith.maximumf %5, %6 : vector<8x64xf32>
    %c0_6 = arith.constant 0 : index
    %c0_7 = arith.constant 0 : index
    %8 = vector.load %arg4[%c0_6, %c0_7] : memref<64x64xf32, #tpu.memory_space<vmem>>, vector<64x64xf32>
    %cst_8 = arith.constant dense<0.000000e+00> : vector<8x64xf32>
    %9 = tpu.matmul %7, %8, %cst_8 {dimension_numbers = #tpu.dot_dimension_numbers<[1], [0], [0], [1], [0, 0, 1, 1], [], []>} : vector<8x64xf32>, vector<64x64xf32>, vector<8x64xf32> -> vector<8x64xf32>
    %c0_9 = arith.constant 0 : index
    %c0_10 = arith.constant 0 : index
    %10 = vector.load %arg5[%c0_9, %c0_10] : memref<1x64xf32, #tpu.memory_space<vmem>>, vector<1x64xf32>
    %11 = vector.broadcast %10 : vector<1x64xf32> to vector<8x64xf32>
    %12 = arith.addf %9, %11 : vector<8x64xf32>
    %cst_11 = arith.constant 0.000000e+00 : f32
    %13 = vector.broadcast %cst_11 : f32 to vector<8x64xf32>
    %14 = arith.maximumf %12, %13 : vector<8x64xf32>
    %c0_12 = arith.constant 0 : index
    %c0_13 = arith.constant 0 : index
    %15 = vector.load %arg6[%c0_12, %c0_13] : memref<64x32xf32, #tpu.memory_space<vmem>>, vector<64x32xf32>
    %cst_14 = arith.constant dense<0.000000e+00> : vector<8x32xf32>
    %16 = tpu.matmul %14, %15, %cst_14 {dimension_numbers = #tpu.dot_dimension_numbers<[1], [0], [0], [1], [0, 0, 1, 1], [], []>} : vector<8x64xf32>, vector<64x32xf32>, vector<8x32xf32> -> vector<8x32xf32>
    %c0_15 = arith.constant 0 : index
    %c0_16 = arith.constant 0 : index
    %17 = vector.load %arg7[%c0_15, %c0_16] : memref<1x32xf32, #tpu.memory_space<vmem>>, vector<1x32xf32>
    %18 = vector.broadcast %17 : vector<1x32xf32> to vector<8x32xf32>
    %19 = arith.addf %16, %18 : vector<8x32xf32>
    %cst_17 = arith.constant 0.000000e+00 : f32
    %20 = vector.broadcast %cst_17 : f32 to vector<8x32xf32>
    %21 = arith.maximumf %19, %20 : vector<8x32xf32>
    %c0_18 = arith.constant 0 : index
    %c0_19 = arith.constant 0 : index
    %22 = vector.load %arg8[%c0_18, %c0_19] : memref<32x32xf32, #tpu.memory_space<vmem>>, vector<32x32xf32>
    %cst_20 = arith.constant dense<0.000000e+00> : vector<8x32xf32>
    %23 = tpu.matmul %21, %22, %cst_20 {dimension_numbers = #tpu.dot_dimension_numbers<[1], [0], [0], [1], [0, 0, 1, 1], [], []>} : vector<8x32xf32>, vector<32x32xf32>, vector<8x32xf32> -> vector<8x32xf32>
    %c0_21 = arith.constant 0 : index
    %c0_22 = arith.constant 0 : index
    %24 = vector.load %arg9[%c0_21, %c0_22] : memref<1x32xf32, #tpu.memory_space<vmem>>, vector<1x32xf32>
    %25 = vector.broadcast %24 : vector<1x32xf32> to vector<8x32xf32>
    %26 = arith.addf %23, %25 : vector<8x32xf32>
    %cst_23 = arith.constant 0.000000e+00 : f32
    %27 = vector.broadcast %cst_23 : f32 to vector<8x32xf32>
    %28 = arith.maximumf %26, %27 : vector<8x32xf32>
    %c0_24 = arith.constant 0 : index
    %c0_25 = arith.constant 0 : index
    %29 = vector.load %arg10[%c0_24, %c0_25] : memref<32x128xf32, #tpu.memory_space<vmem>>, vector<32x128xf32>
    %cst_26 = arith.constant dense<0.000000e+00> : vector<8x128xf32>
    %30 = tpu.matmul %28, %29, %cst_26 {dimension_numbers = #tpu.dot_dimension_numbers<[1], [0], [0], [1], [0, 0, 1, 1], [], []>} : vector<8x32xf32>, vector<32x128xf32>, vector<8x128xf32> -> vector<8x128xf32>
    %c0_27 = arith.constant 0 : index
    %c0_28 = arith.constant 0 : index
    %31 = vector.load %arg11[%c0_27, %c0_28] : memref<1x128xf32, #tpu.memory_space<vmem>>, vector<1x128xf32>
    %32 = vector.broadcast %31 : vector<1x128xf32> to vector<8x128xf32>
    %33 = arith.addf %30, %32 : vector<8x128xf32>
    %c0_29 = arith.constant 0 : index
    %c0_30 = arith.constant 0 : index
    %34 = vector.load %arg12[%c0_29, %c0_30] : memref<8x128xf32, #tpu.memory_space<vmem>>, vector<8x128xf32>
    tpu.vector_store %arg12[%c0_29, %c0_30], %33 {strides = array<i32>} : memref<8x128xf32, #tpu.memory_space<vmem>>, vector<8x128xf32>,
    return
  }
  func.func @transform_0(%arg0: i32) -> (i32, i32) {
    %c0_i32 = arith.constant 0 : i32
    %c0_i32_0 = arith.constant 0 : i32
    return %arg0, %c0_i32 : i32, i32
  }
  func.func @transform_1(%arg0: i32) -> (i32, i32) {
    %c0_i32 = arith.constant 0 : i32
    %c0_i32_0 = arith.constant 0 : i32
    %c0_i32_1 = arith.constant 0 : i32
    return %c0_i32, %c0_i32_0 : i32, i32
  }
  func.func @transform_2(%arg0: i32) -> (i32, i32) {
    %c0_i32 = arith.constant 0 : i32
    %c0_i32_0 = arith.constant 0 : i32
    %c0_i32_1 = arith.constant 0 : i32
    return %c0_i32, %c0_i32_0 : i32, i32
  }
  func.func @transform_3(%arg0: i32) -> (i32, i32) {
    %c0_i32 = arith.constant 0 : i32
    %c0_i32_0 = arith.constant 0 : i32
    %c0_i32_1 = arith.constant 0 : i32
    return %c0_i32, %c0_i32_0 : i32, i32
  }
  func.func @transform_4(%arg0: i32) -> (i32, i32) {
    %c0_i32 = arith.constant 0 : i32
    %c0_i32_0 = arith.constant 0 : i32
    %c0_i32_1 = arith.constant 0 : i32
    return %c0_i32, %c0_i32_0 : i32, i32
  }
  func.func @transform_5(%arg0: i32) -> (i32, i32) {
    %c0_i32 = arith.constant 0 : i32
    %c0_i32_0 = arith.constant 0 : i32
    %c0_i32_1 = arith.constant 0 : i32
    return %c0_i32, %c0_i32_0 : i32, i32
  }
  func.func @transform_6(%arg0: i32) -> (i32, i32) {
    %c0_i32 = arith.constant 0 : i32
    %c0_i32_0 = arith.constant 0 : i32
    %c0_i32_1 = arith.constant 0 : i32
    return %c0_i32, %c0_i32_0 : i32, i32
  }
  func.func @transform_7(%arg0: i32) -> (i32, i32) {
    %c0_i32 = arith.constant 0 : i32
    %c0_i32_0 = arith.constant 0 : i32
    %c0_i32_1 = arith.constant 0 : i32
    return %c0_i32, %c0_i32_0 : i32, i32
  }
  func.func @transform_8(%arg0: i32) -> (i32, i32) {
    %c0_i32 = arith.constant 0 : i32
    %c0_i32_0 = arith.constant 0 : i32
    %c0_i32_1 = arith.constant 0 : i32
    return %c0_i32, %c0_i32_0 : i32, i32
  }
  func.func @transform_9(%arg0: i32) -> (i32, i32) {
    %c0_i32 = arith.constant 0 : i32
    %c0_i32_0 = arith.constant 0 : i32
    %c0_i32_1 = arith.constant 0 : i32
    return %c0_i32, %c0_i32_0 : i32, i32
  }
  func.func @transform_10(%arg0: i32) -> (i32, i32) {
    %c0_i32 = arith.constant 0 : i32
    %c0_i32_0 = arith.constant 0 : i32
    %c0_i32_1 = arith.constant 0 : i32
    return %c0_i32, %c0_i32_0 : i32, i32
  }
  func.func @transform_11(%arg0: i32) -> (i32, i32) {
    %c0_i32 = arith.constant 0 : i32
    %c0_i32_0 = arith.constant 0 : i32
    return %arg0, %c0_i32 : i32, i32
  }
}

</mosaic_0001>

<bundles_post_ra>
// kernel: projector_forward.1
= control target key start
LH: loop header
LB: loop body
LE: loop exit
PB: predicated region body
PF: predicated region fallthrough
CT: control target
= control target key end

     0   :  { %v628_v1 = vmov 0.0   ;;  %vm629_vm0 = vmmov 0   ;;  %s839_s0 = inlined_call_operand.vmem [shape: f32[8,32], index: 0, kind: input, shape index: {}]   ;;  %s840_s1 = inlined_call_operand.vmem [shape: f32[32,64], index: 1, kind: input, shape index: {}]   ;;  %s841_s2 = inlined_call_operand.vmem [shape: f32[1,64], index: 2, kind: input, shape index: {}]   ;;  %s842_s3 = inlined_call_operand.vmem [shape: f32[64,64], index: 3, kind: input, shape index: {}]   ;;  %s843_s4 = inlined_call_operand.vmem [shape: f32[1,64], index: 4, kind: input, shape index: {}]   ;;  %s844_s5 = inlined_call_operand.vmem [shape: f32[64,32], index: 5, kind: input, shape index: {}]   ;;  %s845_s6 = inlined_call_operand.vmem [shape: f32[1,32], index: 6, kind: input, shape index: {}]   ;;  %s846_s7 = inlined_call_operand.vmem [shape: f32[32,32], index: 7, kind: input, shape index: {}]   ;;  %s847_s8 = inlined_call_operand.vmem [shape: f32[1,32], index: 8, kind: input, shape index: {}]   ;;  %s848_s9 = inlined_call_operand.vmem [shape: f32[32,128], index: 9, kind: input, shape index: {}]   ;;  %s849_s10 = inlined_call_operand.vmem [shape: f32[1,128], index: 10, kind: input, shape index: {}]   ;;  %s850_s11 = inlined_call_operand.hbm [shape: f32[8,128], index: 11, kind: output, shape index: {}]  }
   0x1   :  { %v43_v0 = vld [vmem:[%s840_s1 + $0x18] sm:$0xff]  ;;  %532 = vmatprep.subr.mxu0 %v628_v1  ;;  %v42_v2 = vld [vmem:[%s840_s1 + $0x10] sm:$0xff]  ;;  %540 = vmatprep.mubr.msk.f32.mxu0 %vm629_vm0, %v628_v1  ;;  %v41_v5 = vld [vmem:[%s840_s1 + $0x8] sm:$0xff] }
   0x2   :  { %v133_v3 = vld [vmem:[%s842_s3 + $0x38] sm:$0xff]  ;;  %533 = vmatpush3.msra.mxu0 %v43_v0  ;;  %543 = vmatprep.subr.mxu1 %v628_v1  ;;  %v132_v4 = vld [vmem:[%s842_s3 + $0x30] sm:$0xff] }
   0x3   :  { %534 = vmatprep.subr.mxu0 %v628_v1  ;;  %544 = vmatpush3.msra.mxu1 %v133_v3 }
   0x4   :  { %16 = vsyncpa [#allocation3], 0  ;;  %535 = vmatpush3.msra.mxu0 %v42_v2  ;;  %545 = vmatprep.subr.mxu1 %v628_v1  ;;  %v131_v6 = vld [vmem:[%s842_s3 + $0x28] sm:$0xff]  ;;  %v40_v7 = vld [vmem:[%s840_s1] sm:$0xff]  ;;  %vm51_vm1 = vcmask 261120   ;;  %vm141_vm2 = vcmask 523264  }
   0x5   :  { %536 = vmatprep.subr.mxu0 %v628_v1  ;;  %546 = vmatpush3.msra.mxu1 %v132_v4  ;;  %v39_v8 = vld [vmem:[%s839_s0] sm:$0xff]  ;;  %v129_v10 = vld [vmem:[%s842_s3 + $0x18] sm:$0xff]  ;;  %v128_v11 = vld [vmem:[%s842_s3 + $0x10] sm:$0xff]  ;;  %s630_s16 = smov [#allocation2]  }
   0x6   :  { %537 = vmatpush3.msra.mxu0 %v41_v5  ;;  %547 = vmatprep.subr.mxu1 %v628_v1  ;;  %v130_v9 = vld [vmem:[%s842_s3 + $0x20] sm:$0xff]  ;;  %v127_v12 = vld [vmem:[%s842_s3 + $0x8] sm:$0xff]  ;;  %v223_v14 = vld [vmem:[%s844_s5 + $0x38] sm:$0xff] }
   0x7   :  { %538 = vmatprep.subr.mxu0 %v628_v1  ;;  %548 = vmatpush3.msra.mxu1 %v131_v6  ;;  %v126_v13 = vld [vmem:[%s842_s3] sm:$0xff]  ;;  %v222_v15 = vld [vmem:[%s844_s5 + $0x30] sm:$0xff]  ;;  %v221_v16 = vld [vmem:[%s844_s5 + $0x28] sm:$0xff] }
   0x8   :  { %539 = vmatpush3.msra.mxu0 %v40_v7  ;;  %549 = vmatprep.subr.mxu1 %v628_v1  ;;  %v220_v17 = vld [vmem:[%s844_s5 + $0x20] sm:$0xff]  ;;  %v219_v18 = vld [vmem:[%s844_s5 + $0x18] sm:$0xff]  ;;  %v218_v24 = vld [vmem:[%s844_s5 + $0x10] sm:$0xff] }
   0x9   :  { %541 = vmatmul.mubr.msk.f32.vlgmr.msra.gmra.mxu0 %vm51_vm1, %v39_v8  ;;  %550 = vmatpush3.msra.mxu1 %v130_v9  ;;  %v489_v19 = vld [vmem:[%s841_s2] ss:$0 sm:$0xff]  ;;  %v217_v25 = vld [vmem:[%s844_s5 + $0x8] sm:$0xff]  ;;  %v308_v27 = vld [vmem:[%s846_s7 + $0x18] sm:$0xff]  ;;  %s481_s2 = sshll.u32 %s630_s16, 4  ;;  %s482_s2 = int_to_ptr.vmem [resolvable:$true] %s481_s2 }
   0xa   :  { %551 = vmatprep.subr.mxu1 %v628_v1  ;;  %559 = vmatprep.mubr.msk.f32.mxu1 %vm629_vm0, %v628_v1  ;;  %v216_v26 = vld [vmem:[%s844_s5] sm:$0xff]  ;;  %v307_v33 = vld [vmem:[%s846_s7 + $0x10] sm:$0xff]  ;;  %v306_v34 = vld [vmem:[%s846_s7 + $0x8] sm:$0xff]  ;;  %p611_p1 = scmp.lt.s32.totalorder %s482_s2, %s482_s2 }
   0xb   :  { %552 = vmatpush3.msra.mxu1 %v129_v10  ;;  %562 = vmatprep.subr.mxu0 %v628_v1  ;;  %v491_v28 = vld [vmem:[%s843_s4] ss:$0 sm:$0xff]  ;;  %v393_v36 = vld [vmem:[%s848_s9 + $0x18] sm:$0xff]  ;;  %v392_v42 = vld [vmem:[%s848_s9 + $0x10] sm:$0xff] }
   0xc   :  { %553 = vmatprep.subr.mxu1 %v628_v1  ;;  %578 = vmatprep.mubr.msk.f32.mxu0 %vm629_vm0, %v628_v1  ;;  %v305_v35 = vld [vmem:[%s846_s7] sm:$0xff]  ;;  %v391_v43 = vld [vmem:[%s848_s9 + $0x8] sm:$0xff] }
   0xd   :  { %554 = vmatpush3.msra.mxu1 %v128_v11  ;;  %563 = vmatpush3.msra.mxu0 %v223_v14  ;;  %v493_v37 = vld [vmem:[%s845_s6] ss:$0 sm:$0xff] }
   0xe   :  { %555 = vmatprep.subr.mxu1 %v628_v1  ;;  %564 = vmatprep.subr.mxu0 %v628_v1  ;;  %v390_v44 = vld [vmem:[%s848_s9] sm:$0xff]  ;;  %s606_s9 = scalar_lea.vmem %s482_s2, 128 }
   0xf   :  { %556 = vmatpush3.msra.mxu1 %v127_v12  ;;  %565 = vmatpush3.msra.mxu0 %v222_v15  ;;  %v495_v45 = vld [vmem:[%s847_s8] ss:$0 sm:$0xff]  ;;  %p607_p0 = scmp.ne.s32.totalorder %s482_s2, %s606_s9  ;;  %p612_p2 = scmp.lt.s32.totalorder %s606_s9, %s606_s9 }
  0x10   :  { %557 = vmatprep.subr.mxu1 %v628_v1  ;;  %566 = vmatprep.subr.mxu0 %v628_v1  ;;  %v497_v50 = vld [vmem:[%s849_s10] ss:$0 sm:$0xff] }
  0x11   :  { %558 = vmatpush3.msra.mxu1 %v126_v13  ;;  %567 = vmatpush3.msra.mxu0 %v221_v16  ;;  %p613_p3 = por %p612_p2, %p611_p1 }
  0x12   :  { %581 = vmatprep.subr.mxu1 %v628_v1  ;;  %568 = vmatprep.subr.mxu0 %v628_v1 }
  0x13   :  { %569 = vmatpush3.msra.mxu0 %v220_v17  ;;  %p614_p4 = pnand %p613_p3, %p607_p0 }
  0x14   :  { %570 = vmatprep.subr.mxu0 %v628_v1 }
  0x15   :  { %571 = vmatpush3.msra.mxu0 %v219_v18 }
  0x16   :  { %572 = vmatprep.subr.mxu0 %v628_v1 }
  0x17   :  { %573 = vmatpush3.msra.mxu0 %v218_v24 }
  0x18   :  { %574 = vmatprep.subr.mxu0 %v628_v1 }
  0x19   :  { %575 = vmatpush3.msra.mxu0 %v217_v25 }
  0x1a   :  { %576 = vmatprep.subr.mxu0 %v628_v1 }
  0x1b   :  { %577 = vmatpush3.msra.mxu0 %v216_v26 }
  0x1c   :  { %592 = vmatprep.subr.mxu0 %v628_v1 }
  0xc9   :  { %v121_v20 = vpop.f32.mrf.mxu0 }
  0xca   :  { %v122_v21 = vadd.f32 %v489_v19, %v121_v20 }
  0xcb   :  { %v542_v22 = vpop.f32.mrf.mxu0 }
  0xcc   :  { %v125_v23 = vmax.f32 %v122_v21, 0.0 }
  0xce   :  { %560 = vmatmul.mubr.msk.f32.vlgmr.msra.gmra.mxu1 %vm141_vm2, %v125_v23 }
  0xcf   :  { %589 = vmatprep.mubr.msk.f32.mxu1 %vm629_vm0, %v628_v1  ;;  %582 = vmatpush3.msra.mxu1 %v308_v27 }
  0xd0   :  { %583 = vmatprep.subr.mxu1 %v628_v1 }
  0xd1   :  { %584 = vmatpush3.msra.mxu1 %v307_v33 }
  0xd2   :  { %585 = vmatprep.subr.mxu1 %v628_v1 }
  0xd3   :  { %586 = vmatpush3.msra.mxu1 %v306_v34 }
  0xd4   :  { %587 = vmatprep.subr.mxu1 %v628_v1 }
  0xd5   :  { %588 = vmatpush3.msra.mxu1 %v305_v35 }
 0x18e   :  { %v211_v29 = vpop.f32.mrf.mxu1 }
 0x18f   :  { %v212_v30 = vadd.f32 %v491_v28, %v211_v29 }
 0x190   :  { %v561_v31 = vpop.f32.mrf.mxu1 }
 0x191   :  { %v215_v32 = vmax.f32 %v212_v30, 0.0 }
 0x193   :  { %579 = vmatmul.mubr.msk.f32.vlgmr.msra.gmra.mxu0 %vm141_vm2, %v215_v32 }
 0x194   :  { %600 = vmatprep.mubr.msk.f32.mxu0 %vm629_vm0, %v628_v1  ;;  %593 = vmatpush3.msra.mxu0 %v393_v36 }
 0x195   :  { %594 = vmatprep.subr.mxu0 %v628_v1 }
 0x196   :  { %595 = vmatpush3.msra.mxu0 %v392_v42 }
 0x197   :  { %596 = vmatprep.subr.mxu0 %v628_v1 }
 0x198   :  { %597 = vmatpush3.msra.mxu0 %v391_v43 }
 0x199   :  { %598 = vmatprep.subr.mxu0 %v628_v1 }
 0x19a   :  { %599 = vmatpush3.msra.mxu0 %v390_v44 }
 0x253   :  { %v300_v38 = vpop.f32.mrf.mxu0 }
 0x254   :  { %v301_v39 = vadd.f32 %v493_v37, %v300_v38 }
 0x255   :  { %v580_v40 = vpop.f32.mrf.mxu0 }
 0x256   :  { %v304_v41 = vmax.f32 %v301_v39, 0.0 }
 0x258   :  { %590 = vmatmul.mubr.msk.f32.vlgmr.msra.gmra.mxu1 %vm51_vm1, %v304_v41 }
 0x318   :  { %v385_v46 = vpop.f32.mrf.mxu1 }
 0x319   :  { %v386_v47 = vadd.f32 %v495_v45, %v385_v46 }
 0x31a   :  { %v591_v48 = vpop.f32.mrf.mxu1 }
 0x31b   :  { %v389_v49 = vmax.f32 %v386_v47, 0.0 }
 0x31d   :  { %601 = vmatmul.mubr.msk.f32.vlgmr.msra.gmra.mxu0 %vm51_vm1, %v389_v49 }
 0x3dd   :  { %v470_v51 = vpop.f32.mrf.mxu0 }
 0x3de   :  { %v471_v52 = vadd.f32 %v497_v50, %v470_v51 }
 0x3df   :  { %v602_v53 = vpop.f32.mrf.mxu0 }
 0x3e0   :  { %474 = vst [vmem:[#allocation2] sm:$0xff] %v471_v52 }
 0x3e1   :  { %617 = shalt.err (!%p614_p4)
}
 0x3e2   :  { %484 = dma.vmem_to_hbm [thread:$0]  %s482_s2, 128, %s850_s11, [#allocation3]  }
 0x3e3   :  { %626 = dma.done.wait [#allocation3], 128  }
 0x3e4   :  { %627 = vsyncadd [#allocation3], 4294967168 }
 0x3e5   :  { %488 = vsyncpa [#allocation3], 1 }

</bundles_post_ra>
